<compile_context>
chip_gen: v5e
topology: v5e:2x2
jax: 0.10.0
libtpu: 0.0.40
codegen_flags: <defaults>
</compile_context>

<pallas_src>
import functools

import jax
import jax.numpy as jnp
from jax.experimental import pallas as pl
from jax.experimental.pallas import tpu as pltpu

LANE = 128            # vreg lane width
MAX_TILE_ROWS = 1024  # 1024 x 128 x 4B = 512 KiB per array per buffer


# ---------------------------------------------------------------------------
# Shared elementwise math (used by the kernel body and by the pure-JAX reference)
# ---------------------------------------------------------------------------
def _cone_math(axis1, arg1, axis2, arg2, conj_mode, delta_none):
    arg_int = jnp.minimum(arg1, arg2)
    axis_int = jnp.minimum(axis1, axis2)

    upper1 = axis1 + arg1
    lower1 = axis1 - arg1
    upper2 = axis2 + arg2
    lower2 = axis2 - arg2

    mask11 = (upper1 >= upper2) & (upper2 >= lower1) & (lower1 >= lower2)
    mask12 = (upper1 >= upper2) & (upper2 >= lower2) & (lower2 > lower1)
    mask13 = (upper1 >= lower1) & (lower1 > upper2) & (upper2 >= lower2)
    mask21 = (upper2 >= upper1) & (upper1 >= lower2) & (lower2 >= lower1)
    mask22 = (upper2 >= upper1) & (upper1 >= lower1) & (lower1 > lower2)
    mask23 = (upper2 >= lower2) & (lower2 > upper1) & (upper1 >= lower1)

    zeros = jnp.zeros_like(arg_int)

    if conj_mode == 'all':
        arg_updates = [
            (mask11, jnp.abs(upper2 - lower1) * 0.5),
            (mask12, arg2),
            (mask13, zeros),
            (mask21, jnp.abs(upper1 - lower2) * 0.5),
            (mask22, arg1),
            (mask23, zeros),
        ]
        for m, v in arg_updates:                    # later masks overwrite earlier ones
            arg_int = jnp.where(m, v, arg_int)
        axis_updates = [                            # axis updates read the FINAL arg_int
            (mask11, upper2 - arg_int),
            (mask12, axis2),
            (mask13, delta_none * lower1 + (1.0 - delta_none) * upper2),
            (mask21, upper1 - arg_int),
            (mask22, axis1),
            (mask23, delta_none * lower2 + (1.0 - delta_none) * upper1),
        ]
        for m, v in axis_updates:
            axis_int = jnp.where(m, v, axis_int)

    elif conj_mode == 'partial':
        half_21 = jnp.abs(upper2 - lower1) * 0.5
        half_12 = jnp.abs(upper1 - lower2) * 0.5
        arg_updates = [
            (mask11, half_21), (mask12, half_21), (mask13, half_21),
            (mask21, half_12), (mask22, half_12), (mask23, half_12),
        ]
        for m, v in arg_updates:
            arg_int = jnp.where(m, v, arg_int)
        axis_updates = [
            (mask11, upper2 - arg_int), (mask12, upper2 - arg_int), (mask13, upper2 - arg_int),
            (mask21, upper1 - arg_int), (mask22, upper1 - arg_int), (mask23, upper1 - arg_int),
        ]
        for m, v in axis_updates:
            axis_int = jnp.where(m, v, axis_int)

    elif conj_mode == 'complete':
        arg_updates = [
            (mask11, arg2), (mask12, arg2), (mask13, arg2),
            (mask21, arg1), (mask22, arg1), (mask23, arg1),
        ]
        for m, v in arg_updates:
            arg_int = jnp.where(m, v, arg_int)
        axis_updates = [
            (mask11, axis2), (mask12, axis2), (mask13, axis2),
            (mask21, axis1), (mask22, axis1), (mask23, axis1),
        ]
        for m, v in axis_updates:
            axis_int = jnp.where(m, v, axis_int)

    elif conj_mode == 'none':
        arg_int = zeros
        val_1x = lower1 - jnp.abs(lower1 - upper2) * 0.5
        val_2x = lower2 - jnp.abs(lower2 - upper1) * 0.5
        axis_updates = [
            (mask11, val_1x), (mask12, val_1x), (mask13, val_1x),
            (mask21, val_2x), (mask22, val_2x), (mask23, val_2x),
        ]
        for m, v in axis_updates:
            axis_int = jnp.where(m, v, axis_int)
    else:
        raise ValueError(f"unknown conj_mode: {conj_mode}")

    return axis_int, arg_int


# ---------------------------------------------------------------------------
# Pallas kernel + wrapper
# ---------------------------------------------------------------------------
def _intersection_cone_kernel(axis1_ref, arg1_ref, axis2_ref, arg2_ref,
                              axis_out_ref, arg_out_ref, *, conj_mode, delta_none):
    axis1 = axis1_ref[...].astype(jnp.float32)
    arg1 = arg1_ref[...].astype(jnp.float32)
    axis2 = axis2_ref[...].astype(jnp.float32)
    arg2 = arg2_ref[...].astype(jnp.float32)

    axis_int, arg_int = _cone_math(axis1, arg1, axis2, arg2, conj_mode, delta_none)

    axis_out_ref[...] = axis_int.astype(axis_out_ref.dtype)
    arg_out_ref[...] = arg_int.astype(arg_out_ref.dtype)


def intersection_cone(cone1, cone2, conj_mode, delta_none):
    """Pallas implementation of intersection_cone. Returns (axis_int, arg_int)."""
    axis1, arg1 = cone1
    axis2, arg2 = cone2
    assert axis1.shape == arg1.shape == axis2.shape == arg2.shape
    orig_shape = axis1.shape
    dtype = axis1.dtype
    total = axis1.size

    # Lane-dense (rows, 128) view; rows padded to a multiple of 8 (sublane tiling)
    # and of the row-tile so every block is full-size and stores are unmasked.
    rows = -(-total // LANE)
    rows = max(8, ((rows + 7) // 8) * 8)
    tile_r = min(MAX_TILE_ROWS, rows)
    rows_padded = ((rows + tile_r - 1) // tile_r) * tile_r
    padded_total = rows_padded * LANE
    pad = padded_total - total

    def to2d(x):
        flat = x.reshape(-1)
        if pad:
            flat = jnp.pad(flat, (0, pad))
        return flat.reshape(rows_padded, LANE)

    spec = pl.BlockSpec((tile_r, LANE), lambda i: (i, 0))
    kernel = functools.partial(
        _intersection_cone_kernel, conj_mode=conj_mode, delta_none=float(delta_none)
    )

    axis_out2d, arg_out2d = pl.pallas_call(
        kernel,
        out_shape=(
            jax.ShapeDtypeStruct((rows_padded, LANE), dtype),
            jax.ShapeDtypeStruct((rows_padded, LANE), dtype),
        ),
        grid=(rows_padded // tile_r,),
        in_specs=[spec, spec, spec, spec],
        out_specs=(spec, spec),
        compiler_params=pltpu.CompilerParams(
            dimension_semantics=("parallel",),  # shard row loop across v7x's 2 TCs
        ),
    )(to2d(axis1), to2d(arg1), to2d(axis2), to2d(arg2))

    axis_out = axis_out2d.reshape(-1)[:total].reshape(orig_shape)
    arg_out = arg_out2d.reshape(-1)[:total].reshape(orig_shape)
    return axis_out, arg_out


class Intersection:
    """Functional JAX/Pallas port of the PyTorch Intersection module."""

    def __init__(self, dim, logic_mode, conj_mode, delta_none):
        self.dim = dim
        self.logic_mode = logic_mode
        self.conj_mode = conj_mode
        self.delta_none = delta_none
        # TODO(synk): logic_mode='attention' (Linear+ReLU+softmax aggregation) not
        # ported to Pallas; this port covers the 'geometry' cone-intersection path.

    def __call__(self, axis_embeddings, arg_embeddings):
        if self.logic_mode == 'geometry':
            n = axis_embeddings.shape[0]
            if n == 2:
                cone1 = (axis_embeddings[0], arg_embeddings[0])
                cone2 = (axis_embeddings[1], arg_embeddings[1])
                return intersection_cone(cone1, cone2, self.conj_mode, self.delta_none)
            elif n == 3:
                cone1 = (axis_embeddings[0], arg_embeddings[0])
                cone2 = (axis_embeddings[1], arg_embeddings[1])
                cone3 = (axis_embeddings[2], arg_embeddings[2])
                cone12 = intersection_cone(cone1, cone2, self.conj_mode, self.delta_none)
                return intersection_cone(cone12, cone3, self.conj_mode, self.delta_none)
        return axis_embeddings, arg_embeddings


# ---------------------------------------------------------------------------
# Pure-JAX reference + self-test
# ---------------------------------------------------------------------------
def _intersection_cone_ref(cone1, cone2, conj_mode, delta_none):
    axis1, arg1 = cone1
    axis2, arg2 = cone2
    return _cone_math(axis1, arg1, axis2, arg2, conj_mode, float(delta_none))


if __name__ == "__main__":
    key = jax.random.PRNGKey(0)
    k1, k2, k3, k4 = jax.random.split(key, 4)
    batch, dim = 8, 32
    delta_none = 0.5

    # ---- 2-cone geometry intersection, conj_mode='all' ----
    axis_emb2 = jax.random.uniform(k1, (2, batch, dim), jnp.float32, -3.0, 3.0)
    arg_emb2 = jax.random.uniform(k2, (2, batch, dim), jnp.float32, 0.0, 3.0)

    mod_all = Intersection(dim=dim, logic_mode='geometry', conj_mode='all',
                           delta_none=delta_none)
    axis_out, arg_out = mod_all(axis_emb2, arg_emb2)
    jax.block_until_ready((axis_out, arg_out))

    ref_axis, ref_arg = _intersection_cone_ref(
        (axis_emb2[0], arg_emb2[0]), (axis_emb2[1], arg_emb2[1]), 'all', delta_none)
    assert jnp.allclose(axis_out, ref_axis, atol=1e-6), "axis mismatch (2-cone, all)"
    assert jnp.allclose(arg_out, ref_arg, atol=1e-6), "arg mismatch (2-cone, all)"

    # ---- 3-cone chained intersection, conj_mode='partial' ----
    axis_emb3 = jax.random.uniform(k3, (3, batch, dim), jnp.float32, -3.0, 3.0)
    arg_emb3 = jax.random.uniform(k4, (3, batch, dim), jnp.float32, 0.0, 3.0)

    mod_partial = Intersection(dim=dim, logic_mode='geometry', conj_mode='partial',
                               delta_none=delta_none)
    axis_out3, arg_out3 = mod_partial(axis_emb3, arg_emb3)
    jax.block_until_ready((axis_out3, arg_out3))

    ref12 = _intersection_cone_ref(
        (axis_emb3[0], arg_emb3[0]), (axis_emb3[1], arg_emb3[1]), 'partial', delta_none)
    ref_axis3, ref_arg3 = _intersection_cone_ref(
        ref12, (axis_emb3[2], arg_emb3[2]), 'partial', delta_none)
    assert jnp.allclose(axis_out3, ref_axis3, atol=1e-6), "axis mismatch (3-cone, partial)"
    assert jnp.allclose(arg_out3, ref_arg3, atol=1e-6), "arg mismatch (3-cone, partial)"

    print("KERNEL_OK")
</pallas_src>

<mosaic_0001>
module attributes {stable_mosaic.version = 11 : i64} {
  func.func @_intersection_cone_kernel(%arg0: i32, %arg1: memref<8x128xf32, #tpu.memory_space<vmem>>, %arg2: memref<8x128xf32, #tpu.memory_space<vmem>>, %arg3: memref<8x128xf32, #tpu.memory_space<vmem>>, %arg4: memref<8x128xf32, #tpu.memory_space<vmem>>, %arg5: memref<8x128xf32, #tpu.memory_space<vmem>>, %arg6: memref<8x128xf32, #tpu.memory_space<vmem>>) attributes {dimension_semantics = [#tpu.dimension_semantics<parallel>], iteration_bounds = array<i64: 1>, scalar_prefetch = 0 : i64, scratch_operands = 0 : i64, tpu.core_type = #tpu.core_type<tc>, window_params = [{transform_indices = @transform_0, window_bounds = array<i64: 8, 128>}, {transform_indices = @transform_1, window_bounds = array<i64: 8, 128>}, {transform_indices = @transform_2, window_bounds = array<i64: 8, 128>}, {transform_indices = @transform_3, window_bounds = array<i64: 8, 128>}, {transform_indices = @transform_4, window_bounds = array<i64: 8, 128>}, {transform_indices = @transform_5, window_bounds = array<i64: 8, 128>}]} {
    %c0 = arith.constant 0 : index
    %c0_0 = arith.constant 0 : index
    %0 = vector.load %arg1[%c0, %c0_0] : memref<8x128xf32, #tpu.memory_space<vmem>>, vector<8x128xf32>
    %c0_1 = arith.constant 0 : index
    %c0_2 = arith.constant 0 : index
    %1 = vector.load %arg2[%c0_1, %c0_2] : memref<8x128xf32, #tpu.memory_space<vmem>>, vector<8x128xf32>
    %c0_3 = arith.constant 0 : index
    %c0_4 = arith.constant 0 : index
    %2 = vector.load %arg3[%c0_3, %c0_4] : memref<8x128xf32, #tpu.memory_space<vmem>>, vector<8x128xf32>
    %c0_5 = arith.constant 0 : index
    %c0_6 = arith.constant 0 : index
    %3 = vector.load %arg4[%c0_5, %c0_6] : memref<8x128xf32, #tpu.memory_space<vmem>>, vector<8x128xf32>
    %4 = arith.minimumf %1, %3 : vector<8x128xf32>
    %5 = arith.minimumf %0, %2 : vector<8x128xf32>
    %6 = arith.addf %0, %1 : vector<8x128xf32>
    %7 = arith.subf %0, %1 : vector<8x128xf32>
    %8 = arith.addf %2, %3 : vector<8x128xf32>
    %9 = arith.subf %2, %3 : vector<8x128xf32>
    %10 = arith.cmpf oge, %6, %8 : vector<8x128xf32>
    %11 = arith.cmpf oge, %8, %7 : vector<8x128xf32>
    %12 = arith.andi %10, %11 : vector<8x128xi1>
    %13 = arith.cmpf oge, %7, %9 : vector<8x128xf32>
    %14 = arith.andi %12, %13 : vector<8x128xi1>
    %15 = arith.cmpf oge, %6, %8 : vector<8x128xf32>
    %16 = arith.cmpf oge, %8, %9 : vector<8x128xf32>
    %17 = arith.andi %15, %16 : vector<8x128xi1>
    %18 = arith.cmpf ogt, %9, %7 : vector<8x128xf32>
    %19 = arith.andi %17, %18 : vector<8x128xi1>
    %20 = arith.cmpf oge, %6, %7 : vector<8x128xf32>
    %21 = arith.cmpf ogt, %7, %8 : vector<8x128xf32>
    %22 = arith.andi %20, %21 : vector<8x128xi1>
    %23 = arith.cmpf oge, %8, %9 : vector<8x128xf32>
    %24 = arith.andi %22, %23 : vector<8x128xi1>
    %25 = arith.cmpf oge, %8, %6 : vector<8x128xf32>
    %26 = arith.cmpf oge, %6, %9 : vector<8x128xf32>
    %27 = arith.andi %25, %26 : vector<8x128xi1>
    %28 = arith.cmpf oge, %9, %7 : vector<8x128xf32>
    %29 = arith.andi %27, %28 : vector<8x128xi1>
    %30 = arith.cmpf oge, %8, %6 : vector<8x128xf32>
    %31 = arith.cmpf oge, %6, %7 : vector<8x128xf32>
    %32 = arith.andi %30, %31 : vector<8x128xi1>
    %33 = arith.cmpf ogt, %7, %9 : vector<8x128xf32>
    %34 = arith.andi %32, %33 : vector<8x128xi1>
    %35 = arith.cmpf oge, %8, %9 : vector<8x128xf32>
    %36 = arith.cmpf ogt, %9, %6 : vector<8x128xf32>
    %37 = arith.andi %35, %36 : vector<8x128xi1>
    %38 = arith.cmpf oge, %6, %7 : vector<8x128xf32>
    %39 = arith.andi %37, %38 : vector<8x128xi1>
    %cst = arith.constant 0.000000e+00 : f32
    %40 = vector.broadcast %cst : f32 to vector<8x128xf32>
    %41 = arith.subf %8, %7 : vector<8x128xf32>
    %42 = math.absf %41 : vector<8x128xf32>
    %cst_7 = arith.constant 5.000000e-01 : f32
    %43 = vector.broadcast %cst_7 : f32 to vector<8x128xf32>
    %44 = arith.mulf %42, %43 : vector<8x128xf32>
    %45 = arith.subf %6, %9 : vector<8x128xf32>
    %46 = math.absf %45 : vector<8x128xf32>
    %cst_8 = arith.constant 5.000000e-01 : f32
    %47 = vector.broadcast %cst_8 : f32 to vector<8x128xf32>
    %48 = arith.mulf %46, %47 : vector<8x128xf32>
    %49 = arith.select %14, %44, %4 : vector<8x128xi1>, vector<8x128xf32>
    %50 = arith.select %19, %3, %49 : vector<8x128xi1>, vector<8x128xf32>
    %51 = arith.select %24, %40, %50 : vector<8x128xi1>, vector<8x128xf32>
    %52 = arith.select %29, %48, %51 : vector<8x128xi1>, vector<8x128xf32>
    %53 = arith.select %34, %1, %52 : vector<8x128xi1>, vector<8x128xf32>
    %54 = arith.select %39, %40, %53 : vector<8x128xi1>, vector<8x128xf32>
    %55 = arith.subf %8, %54 : vector<8x128xf32>
    %cst_9 = arith.constant 5.000000e-01 : f32
    %56 = vector.broadcast %cst_9 : f32 to vector<8x128xf32>
    %57 = arith.mulf %56, %7 : vector<8x128xf32>
    %cst_10 = arith.constant 5.000000e-01 : f32
    %58 = vector.broadcast %cst_10 : f32 to vector<8x128xf32>
    %59 = arith.mulf %58, %8 : vector<8x128xf32>
    %60 = arith.addf %57, %59 : vector<8x128xf32>
    %61 = arith.subf %6, %54 : vector<8x128xf32>
    %cst_11 = arith.constant 5.000000e-01 : f32
    %62 = vector.broadcast %cst_11 : f32 to vector<8x128xf32>
    %63 = arith.mulf %62, %9 : vector<8x128xf32>
    %cst_12 = arith.constant 5.000000e-01 : f32
    %64 = vector.broadcast %cst_12 : f32 to vector<8x128xf32>
    %65 = arith.mulf %64, %6 : vector<8x128xf32>
    %66 = arith.addf %63, %65 : vector<8x128xf32>
    %67 = arith.select %14, %55, %5 : vector<8x128xi1>, vector<8x128xf32>
    %68 = arith.select %19, %2, %67 : vector<8x128xi1>, vector<8x128xf32>
    %69 = arith.select %24, %60, %68 : vector<8x128xi1>, vector<8x128xf32>
    %70 = arith.select %29, %61, %69 : vector<8x128xi1>, vector<8x128xf32>
    %71 = arith.select %34, %0, %70 : vector<8x128xi1>, vector<8x128xf32>
    %72 = arith.select %39, %66, %71 : vector<8x128xi1>, vector<8x128xf32>
    %c0_13 = arith.constant 0 : index
    %c0_14 = arith.constant 0 : index
    %73 = vector.load %arg5[%c0_13, %c0_14] : memref<8x128xf32, #tpu.memory_space<vmem>>, vector<8x128xf32>
    tpu.vector_store %arg5[%c0_13, %c0_14], %72 {strides = array<i32>} : memref<8x128xf32, #tpu.memory_space<vmem>>, vector<8x128xf32>,
    %c0_15 = arith.constant 0 : index
    %c0_16 = arith.constant 0 : index
    %74 = vector.load %arg6[%c0_15, %c0_16] : memref<8x128xf32, #tpu.memory_space<vmem>>, vector<8x128xf32>
    tpu.vector_store %arg6[%c0_15, %c0_16], %54 {strides = array<i32>} : memref<8x128xf32, #tpu.memory_space<vmem>>, vector<8x128xf32>,
    return
  }
  func.func @transform_0(%arg0: i32) -> (i32, i32) {
    %c0_i32 = arith.constant 0 : i32
    %c0_i32_0 = arith.constant 0 : i32
    return %arg0, %c0_i32 : i32, i32
  }
  func.func @transform_1(%arg0: i32) -> (i32, i32) {
    %c0_i32 = arith.constant 0 : i32
    %c0_i32_0 = arith.constant 0 : i32
    return %arg0, %c0_i32 : i32, i32
  }
  func.func @transform_2(%arg0: i32) -> (i32, i32) {
    %c0_i32 = arith.constant 0 : i32
    %c0_i32_0 = arith.constant 0 : i32
    return %arg0, %c0_i32 : i32, i32
  }
  func.func @transform_3(%arg0: i32) -> (i32, i32) {
    %c0_i32 = arith.constant 0 : i32
    %c0_i32_0 = arith.constant 0 : i32
    return %arg0, %c0_i32 : i32, i32
  }
  func.func @transform_4(%arg0: i32) -> (i32, i32) {
    %c0_i32 = arith.constant 0 : i32
    %c0_i32_0 = arith.constant 0 : i32
    return %arg0, %c0_i32 : i32, i32
  }
  func.func @transform_5(%arg0: i32) -> (i32, i32) {
    %c0_i32 = arith.constant 0 : i32
    %c0_i32_0 = arith.constant 0 : i32
    return %arg0, %c0_i32 : i32, i32
  }
}

</mosaic_0001>

<bundles_post_ra>
// kernel: tpu_custom_call.1
= control target key start
LH: loop header
LB: loop body
LE: loop exit
PB: predicated region body
PF: predicated region fallthrough
CT: control target
= control target key end

     0   :  { %11 = vsyncpa [#allocation3], 0  ;;  %s466_s0 = inlined_call_operand.hbm [shape: f32[8,128], index: 0, kind: input, shape index: {}]   ;;  %s467_s1 = inlined_call_operand.hbm [shape: f32[8,128], index: 1, kind: input, shape index: {}]   ;;  %s468_s2 = inlined_call_operand.hbm [shape: f32[8,128], index: 2, kind: input, shape index: {}]   ;;  %s469_s3 = inlined_call_operand.hbm [shape: f32[8,128], index: 3, kind: input, shape index: {}]   ;;  %s470_s4 = inlined_call_operand.hbm [shape: f32[8,128], index: 4, kind: output, shape index: {0}]   ;;  %s471_s5 = inlined_call_operand.hbm [shape: f32[8,128], index: 5, kind: output, shape index: {1}]  }
   0x1   :  { %12 = vsyncpa [#allocation6], 0 }
   0x2   :  { %13 = vsyncpa [#allocation9], 0 }
   0x3   :  { %14 = vsyncpa [#allocation4], 0  ;;  %s32_s20 = sshll.u32 %s467_s1, 4  ;;  %s33_s20 = int_to_ptr.hbm [resolvable:$true] %s32_s20 }
   0x4   :  { %15 = vsyncpa [#allocation12], 0  ;;  %s333_s21 = smov [#allocation5]   ;;  %s21_s25 = sshll.u32 %s466_s0, 4  ;;  %s22_s25 = int_to_ptr.hbm [resolvable:$true] %s21_s25 }
   0x5   :  { %s34_s22 = sshll.u32 %s333_s21, 4  ;;  %s334_s26 = smov [#allocation2]   ;;  %s35_s22 = int_to_ptr.vmem [resolvable:$true] %s34_s22 }
   0x6   :  { %37 = dma.hbm_to_vmem [thread:$0]  %s33_s20, 128, %s35_s22, [#allocation6]  }
   0x7   :  { %s23_s27 = sshll.u32 %s334_s26, 4  ;;  %s43_s30 = sshll.u32 %s468_s2, 4  ;;  %s24_s27 = int_to_ptr.vmem [resolvable:$true] %s23_s27  ;;  %s44_s30 = int_to_ptr.hbm [resolvable:$true] %s43_s30 }
   0x8   :  { %26 = dma.hbm_to_vmem [thread:$0]  %s22_s25, 128, %s24_s27, [#allocation3]  }
   0x9   :  { %s54_s7 = sshll.u32 %s469_s3, 4  ;;  %s335_s8 = smov [#allocation7]   ;;  %s55_s7 = int_to_ptr.hbm [resolvable:$true] %s54_s7 }
   0xa   :  { %s45_s9 = sshll.u32 %s335_s8, 4  ;;  %s336_s0 = smov [#allocation8]   ;;  %s46_s9 = int_to_ptr.vmem [resolvable:$true] %s45_s9 }
   0xb   :  { %48 = dma.hbm_to_vmem [thread:$0]  %s44_s30, 128, %s46_s9, [#allocation6]  }
   0xc   :  { %s56_s10 = sshll.u32 %s336_s0, 4  ;;  %s57_s10 = int_to_ptr.vmem [resolvable:$true] %s56_s10 }
   0xd   :  { %59 = dma.hbm_to_vmem [thread:$0]  %s55_s7, 128, %s57_s10, [#allocation9]  }
   0xe   :  { %323 = dma.done.wait [#allocation3], 128  }
   0xf   :  { %324 = vsyncadd [#allocation3], 4294967168 }
  0x10   :  { %325 = dma.done.wait [#allocation6], 256  }
  0x11   :  { %326 = vsyncadd [#allocation6], 4294967040 }
  0x12   :  { %327 = dma.done.wait [#allocation9], 128  }
  0x13   :  { %328 = vsyncadd [#allocation9], 4294967168  ;;  %v381_v0 = vld [vmem:[#allocation2] sm:$0xff]  ;;  %v77_v1 = vld [vmem:[#allocation5] sm:$0xff]  ;;  %s337_s2 = smov [#allocation11]   ;;  %s156_s13 = sshll.u32 %s471_s5, 4  ;;  %s157_s13 = int_to_ptr.hbm [resolvable:$true] %s156_s13 }
  0x14   :  { %v383_v2 = vld [vmem:[#allocation7] sm:$0xff]  ;;  %v79_v3 = vld [vmem:[#allocation8] sm:$0xff]  ;;  %v386_v4 = vadd.f32 %v77_v1, %v381_v0  ;;  %v83_v5 = vsub.f32 %v381_v0, %v77_v1  ;;  %s154_s3 = sshll.u32 %s337_s2, 4  ;;  %s338_s5 = smov [#allocation10]   ;;  %s155_s3 = int_to_ptr.vmem [resolvable:$true] %s154_s3 }
  0x15   :  { %v84_v6 = vadd.f32 %v79_v3, %v383_v2  ;;  %v85_v7 = vsub.f32 %v383_v2, %v79_v3  ;;  %v80_v11 = vmin.f32 %v77_v1, %v79_v3  ;;  %v81_v26 = vmin.f32 %v381_v0, %v383_v2  ;;  %s143_s14 = sshll.u32 %s338_s5, 4  ;;  %s145_s17 = sshll.u32 %s470_s4, 4  ;;  %s144_s14 = int_to_ptr.vmem [resolvable:$true] %s143_s14  ;;  %s146_s17 = int_to_ptr.hbm [resolvable:$true] %s145_s17 }
  0x16   :  { %vm95_vm7 = vcmp.ge.f32.partialorder %v386_v4, %v83_v5  ;;  %v123_v23 = vmul.f32 0.5, %v83_v5  ;;  %v128_v31 = vmul.f32 0.5, %v386_v4 }
  0x17   :  { %vm86_vm0 = vcmp.ge.f32.partialorder %v386_v4, %v84_v6  ;;  %vm87_vm1 = vcmp.ge.f32.partialorder %v84_v6, %v83_v5  ;;  %vm89_vm2 = vcmp.ge.f32.partialorder %v83_v5, %v85_v7  ;;  %vm91_vm3 = vcmp.ge.f32.partialorder %v84_v6, %v85_v7 }
  0x18   :  { %vm88_vm4 = vmand %vm86_vm0, %vm87_vm1  ;;  %vm93_vm5 = vcmp.gt.f32.partialorder %v85_v7, %v83_v5  ;;  %vm96_vm8 = vcmp.gt.f32.partialorder %v83_v5, %v84_v6  ;;  %v110_v9 = vsub.f32 %v84_v6, %v83_v5  ;;  %v113_v10 = vsub.f32 %v386_v4, %v85_v7 }
  0x19   :  { %vm392_vm6 = vmand %vm88_vm4, %vm89_vm2  ;;  %vm99_vm11 = vcmp.ge.f32.partialorder %v84_v6, %v386_v4  ;;  %vm100_vm12 = vcmp.ge.f32.partialorder %v386_v4, %v85_v7  ;;  %vm102_vm14 = vcmp.ge.f32.partialorder %v85_v7, %v83_v5  ;;  %vm105_vm1 = vcmp.gt.f32.partialorder %v83_v5, %v85_v7 }
  0x1a   :  { %vm92_vm9 = vmand %vm86_vm0, %vm91_vm3  ;;  %v111_v13 = vand.u32 2147483647, %v110_v9  ;;  %v114_v14 = vand.u32 2147483647, %v113_v10  ;;  %vm107_vm4 = vcmp.gt.f32.partialorder %v85_v7, %v386_v4  ;;  %v124_v24 = vmul.f32 0.5, %v84_v6 }
  0x1b   :  { %vm399_vm10 = vmand %vm92_vm9, %vm93_vm5  ;;  %v127_v30 = vmul.f32 0.5, %v85_v7 }
  0x1c   :  { %vm97_vm13 = vmand %vm95_vm7, %vm96_vm8  ;;  %v112_v16 = vmul.f32 0.5, %v111_v13  ;;  %v115_v17 = vmul.f32 0.5, %v114_v14  ;;  %v125_v33 = vadd.f32 %v124_v24, %v123_v23 }
  0x1d   :  { %vm408_vm15 = vmand %vm97_vm13, %vm91_vm3  ;;  %v129_v36 = vadd.f32 %v128_v31, %v127_v30 }
  0x1e   :  { %vm101_vm0 = vmand %vm99_vm11, %vm100_vm12  ;;  %v116_v19 = vsel %vm392_vm6, %v112_v16, %v80_v11 }
  0x1f   :  { %vm412_vm2 = vmand %vm101_vm0, %vm102_vm14  ;;  %v117_v20 = vsel %vm399_vm10, %v79_v3, %v116_v19 }
  0x20   :  { %vm104_vm5 = vmand %vm99_vm11, %vm95_vm7  ;;  %v118_v22 = vsel %vm408_vm15, 0.0, %v117_v20 }
  0x21   :  { %vm426_vm8 = vmand %vm104_vm5, %vm105_vm1  ;;  %v119_v25 = vsel %vm412_vm2, %v115_v17, %v118_v22 }
  0x22   :  { %vm108_vm9 = vmand %vm91_vm3, %vm107_vm4  ;;  %v120_v28 = vsel %vm426_vm8, %v77_v1, %v119_v25 }
  0x23   :  { %vm439_vm11 = vmand %vm108_vm9, %vm95_vm7 }
  0x24   :  { %v121_v29 = vsel %vm439_vm11, 0.0, %v120_v28 }
  0x25   :  { %v122_v32 = vsub.f32 %v84_v6, %v121_v29  ;;  %137 = vst [vmem:[#allocation11] sm:$0xff] %v121_v29  ;;  %v126_v34 = vsub.f32 %v386_v4, %v121_v29 }
  0x26   :  { %159 = dma.vmem_to_hbm [thread:$0]  %s155_s3, 128, %s157_s13, [#allocation12]  }
  0x27   :  { %v130_v35 = vsel %vm392_vm6, %v122_v32, %v81_v26 }
  0x28   :  { %v131_v37 = vsel %vm399_vm10, %v383_v2, %v130_v35 }
  0x29   :  { %v132_v38 = vsel %vm408_vm15, %v125_v33, %v131_v37 }
  0x2a   :  { %v133_v39 = vsel %vm412_vm2, %v126_v34, %v132_v38 }
  0x2b   :  { %v134_v40 = vsel %vm426_vm8, %v381_v0, %v133_v39 }
  0x2c   :  { %v135_v41 = vsel %vm439_vm11, %v129_v36, %v134_v40 }
  0x2d   :  { %136 = vst [vmem:[#allocation10] sm:$0xff] %v135_v41 }
  0x2e   :  { %148 = dma.vmem_to_hbm [thread:$0]  %s144_s14, 128, %s146_s17, [#allocation4]  }
  0x2f   :  { %329 = dma.done.wait [#allocation4], 128  }
  0x30   :  { %330 = vsyncadd [#allocation4], 4294967168 }
  0x31   :  { %331 = dma.done.wait [#allocation12], 128  }
  0x32   :  { %332 = vsyncadd [#allocation12], 4294967168 }
  0x33   :  { %168 = vsyncpa [#allocation3], 1 }
  0x34   :  { %169 = vsyncpa [#allocation6], 1 }
  0x35   :  { %170 = vsyncpa [#allocation9], 1 }
  0x36   :  { %171 = vsyncpa [#allocation4], 1 }
  0x37   :  { %172 = vsyncpa [#allocation12], 1 }

</bundles_post_ra>
